<compile_context>
chip_gen: v7x
topology: tpu7x:2x2x1
jax: 0.10.0
libtpu: 0.0.40
codegen_flags: <defaults>
</compile_context>

<pallas_src>
import functools

import jax
import jax.numpy as jnp
from jax.experimental import pallas as pl
from jax.experimental.pallas import tpu as pltpu


def _channel_attention_kernel(x_ref, w1_ref, w2_ref, e_ref, o_ref, *, C, L):
    # x_ref / o_ref: (Bt, C*L) lane-dense blocks.
    # w1_ref: (C, H), w2_ref: (H, C)  == torch Linear weights, transposed.
    # e_ref: (C, C*L) 0/1 block matrix with E[c, c*L + l] = 1.
    x_tile = x_ref[...]                                # (Bt, C*L), native dtype
    Bt = x_tile.shape[0]

    # AdaptiveMax/AvgPool1d(1): the (Bt, C, L) view is the single relayout we
    # keep (max-pool cannot go to the MXU); avg comes from the same view for
    # free and stays exact f32.
    x3 = x_tile.reshape(Bt, C, L).astype(jnp.float32)
    x_max = jnp.max(x3, axis=-1)                       # (Bt, C)
    x_avg = jnp.sum(x3, axis=-1) * (1.0 / L)           # (Bt, C)

    # Shared MLP: Sequential(Linear(C,H), Linear(H,C), ReLU) applied to both
    # pooled branches in one batched MXU pass (f32 accumulation).
    pooled = jnp.concatenate([x_max, x_avg], axis=0)   # (2*Bt, C)
    w1 = w1_ref[...]                                   # (C, H) f32
    w2 = w2_ref[...]                                   # (H, C) f32
    h = jnp.dot(pooled, w1, preferred_element_type=jnp.float32)  # (2*Bt, H)
    m = jnp.dot(h, w2, preferred_element_type=jnp.float32)       # (2*Bt, C)
    m = jnp.maximum(m, 0.0)                            # ReLU after 2nd Linear

    z = m[:Bt] + m[Bt:]                                # (Bt, C), z >= 0
    feats = 1.0 / (1.0 + jnp.exp(-z))                  # sigmoid (EUP exp)

    # Per-channel gate broadcast along L on the idle MXU (no full-tile
    # broadcast/reshape relayout): gate[b, c*L + l] = feats[b, c].
    gate = jnp.dot(feats, e_ref[...], preferred_element_type=jnp.float32)

    # Multiply + store in the native I/O dtype (bf16 stays bf16 on v6e/v7x).
    o_ref[...] = (x_tile * gate.astype(x_tile.dtype)).astype(o_ref.dtype)


def _vmem_capacity_bytes():
    try:
        return int(pltpu.get_tpu_info().vmem_capacity_bytes)
    except Exception:
        return 64 * 1024 * 1024  # conservative (v7x-sized) fallback


def _choose_block_b(B, row_bytes, target_bytes):
    """Rows per grid step: big enough to amortize the ~0.35us per-step
    overhead, small enough that 2 in + 2 out pipeline buffers plus f32
    intermediates fit the scoped-VMEM budget, and >= 2 grid steps for B >= 16
    so the "parallel" axis can shard across v7x's two TensorCores."""
    max_rows = max(8, (int(target_bytes // max(row_bytes, 1)) // 8) * 8)
    if B < 16:
        # Tiny batch: one full block (block dim == full array dim is legal).
        return B
    bt = min(max_rows, max(8, ((B // 2) // 8) * 8))
    return min(bt, B)


def channel_attention(x, w1, w2, *, block_b=None):
    """x: (B, C, L); w1: (C, H) = torch Linear(C,H).weight.T; w2: (H, C)."""
    B, C, L = x.shape
    H = w1.shape[1]
    CL = C * L
    itemsize = jnp.dtype(x.dtype).itemsize

    # ~4 MiB blocks on 128-MiB-VMEM parts (v5e/v6e), ~2 MiB on 64-MiB v7x.
    vmem_cap = _vmem_capacity_bytes()
    target = (4 << 20) if vmem_cap >= (128 << 20) else (2 << 20)
    Bt = block_b if block_b is not None else _choose_block_b(B, CL * itemsize, target)
    n_blocks = pl.cdiv(B, Bt)  # ragged last block is masked by Pallas; no pad.

    # Flatten (C, L) -> C*L so input/output blocks are lane-dense (full vst).
    x_flat = x.reshape(B, CL)
    w1f = w1.astype(jnp.float32)
    w2f = w2.astype(jnp.float32)
    # Gate-broadcast matrix: E[c, c*L + l] = 1, so feats @ E repeats each
    # channel gate L times along the lane-dense axis.
    e_mat = jnp.repeat(jnp.eye(C, dtype=jnp.float32), L, axis=1)  # (C, C*L)

    # Account for 2 in + 2 out buffers plus ~3 f32 tile-sized intermediates,
    # but never request more than 48 MiB (v7x has only 64 MiB physical VMEM).
    block_f32_bytes = Bt * CL * 4
    vmem_limit = int(min(48 << 20, max(32 << 20, 10 * block_f32_bytes)))

    kernel = functools.partial(_channel_attention_kernel, C=C, L=L)

    # TODO(synk): check whether this toolchain needs pltpu.CORE_PARALLEL
    # instead of "parallel" to split the grid axis across v7x's two TCs.
    out_flat = pl.pallas_call(
        kernel,
        out_shape=jax.ShapeDtypeStruct((B, CL), x.dtype),
        grid_spec=pltpu.PrefetchScalarGridSpec(
            num_scalar_prefetch=0,
            grid=(n_blocks,),
            in_specs=[
                pl.BlockSpec((Bt, CL), lambda b: (b, 0)),
                pl.BlockSpec((C, H), lambda b: (0, 0)),
                pl.BlockSpec((H, C), lambda b: (0, 0)),
                pl.BlockSpec((C, CL), lambda b: (0, 0)),
            ],
            out_specs=pl.BlockSpec((Bt, CL), lambda b: (b, 0)),
        ),
        compiler_params=pltpu.CompilerParams(
            dimension_semantics=("parallel",),
            vmem_limit_bytes=vmem_limit,
        ),
        cost_estimate=pl.CostEstimate(
            flops=8 * B * C * H + 2 * B * C * CL,
            transcendentals=B * C,
            bytes_accessed=2 * B * CL * itemsize,
        ),
    )(x_flat, w1f, w2f, e_mat)

    return out_flat.reshape(B, C, L)


if __name__ == "__main__":
    key = jax.random.PRNGKey(0)
    k_x, k_w1, k_w2, k_x2 = jax.random.split(key, 4)

    C, L, H = 32, 16, 16  # Linear(in_features=32, out_features=16) => C = 32
    # Weights stored transposed for the v @ W form (== torch Linear weight.T).
    w1 = jax.random.normal(k_w1, (C, H), dtype=jnp.float32) * 0.1
    w2 = jax.random.normal(k_w2, (H, C), dtype=jnp.float32) * 0.1

    # Pure-JAX reference encoding the exact module semantics:
    #   mlp = Sequential(Linear(32,16,bias=False), Linear(16,32,bias=False), ReLU)
    #   feats = sigmoid(mlp(maxpool(x)) + mlp(avgpool(x))); out = x * feats[..., None]
    hp = jax.lax.Precision.HIGHEST

    def ref(x, w1, w2):
        x_max = jnp.max(x, axis=-1)
        x_avg = jnp.mean(x, axis=-1)

        def mlp(v):
            return jnp.maximum(
                jnp.matmul(jnp.matmul(v, w1, precision=hp), w2, precision=hp), 0.0)

        feats = jax.nn.sigmoid(mlp(x_max) + mlp(x_avg))
        return x * feats[..., None]

    # Tolerance covers the TPU MXU's default (bf16-pass) precision on the
    # small MLP/gate matmuls; structural errors would be O(1e-1) or larger.
    ATOL = RTOL = 5e-3

    # Case 1: tiny batch (single full block).
    B = 2
    x = jax.random.normal(k_x, (B, C, L), dtype=jnp.float32)
    out = jax.block_until_ready(channel_attention(x, w1, w2))
    assert out.shape == (B, C, L)
    assert jnp.allclose(out, ref(x, w1, w2), atol=ATOL, rtol=RTOL), float(
        jnp.max(jnp.abs(out - ref(x, w1, w2))))

    # Case 2: multi-block grid with a ragged last block (no pad/slice path).
    B2 = 20
    x2 = jax.random.normal(k_x2, (B2, C, L), dtype=jnp.float32)
    out2 = jax.block_until_ready(channel_attention(x2, w1, w2))
    assert out2.shape == (B2, C, L)
    assert jnp.allclose(out2, ref(x2, w1, w2), atol=ATOL, rtol=RTOL), float(
        jnp.max(jnp.abs(out2 - ref(x2, w1, w2))))

    print("KERNEL_OK")
</pallas_src>

<mosaic_0001>
module attributes {stable_mosaic.version = 11 : i64} {
  func.func @_channel_attention_kernel(%arg0: i32, %arg1: memref<2x512xf32, #tpu.memory_space<vmem>>, %arg2: memref<32x16xf32, #tpu.memory_space<vmem>>, %arg3: memref<16x32xf32, #tpu.memory_space<vmem>>, %arg4: memref<32x512xf32, #tpu.memory_space<vmem>>, %arg5: memref<2x512xf32, #tpu.memory_space<vmem>>) attributes {dimension_semantics = [#tpu.dimension_semantics<parallel>], iteration_bounds = array<i64: 1>, scalar_prefetch = 0 : i64, scratch_operands = 0 : i64, tpu.core_type = #tpu.core_type<tc>, window_params = [{transform_indices = @transform_0, window_bounds = array<i64: 2, 512>}, {pipeline_mode = #tpu.pipeline_mode<synchronous>, transform_indices = @transform_1, window_bounds = array<i64: 32, 16>}, {pipeline_mode = #tpu.pipeline_mode<synchronous>, transform_indices = @transform_2, window_bounds = array<i64: 16, 32>}, {pipeline_mode = #tpu.pipeline_mode<synchronous>, transform_indices = @transform_3, window_bounds = array<i64: 32, 512>}, {transform_indices = @transform_4, window_bounds = array<i64: 2, 512>}]} {
    %c0 = arith.constant 0 : index
    %c0_0 = arith.constant 0 : index
    %0 = vector.load %arg1[%c0, %c0_0] : memref<2x512xf32, #tpu.memory_space<vmem>>, vector<2x512xf32>
    %1 = vector.shape_cast %0 : vector<2x512xf32> to vector<2x32x16xf32>
    %cst = arith.constant dense<0xFF800000> : vector<2x32xf32>
    %2 = vector.multi_reduction <maximumf>, %1, %cst [2] : vector<2x32x16xf32> to vector<2x32xf32>
    %cst_1 = arith.constant dense<0.000000e+00> : vector<2x32xf32>
    %3 = vector.multi_reduction <add>, %1, %cst_1 [2] : vector<2x32x16xf32> to vector<2x32xf32>
    %cst_2 = arith.constant 6.250000e-02 : f32
    %4 = vector.broadcast %cst_2 : f32 to vector<2x32xf32>
    %5 = arith.mulf %3, %4 : vector<2x32xf32>
    %6 = tpu.concatenate %2, %5 in 0 : vector<2x32xf32>, vector<2x32xf32> -> vector<4x32xf32>
    %c0_3 = arith.constant 0 : index
    %c0_4 = arith.constant 0 : index
    %7 = vector.load %arg2[%c0_3, %c0_4] : memref<32x16xf32, #tpu.memory_space<vmem>>, vector<32x16xf32>
    %c0_5 = arith.constant 0 : index
    %c0_6 = arith.constant 0 : index
    %8 = vector.load %arg3[%c0_5, %c0_6] : memref<16x32xf32, #tpu.memory_space<vmem>>, vector<16x32xf32>
    %cst_7 = arith.constant dense<0.000000e+00> : vector<4x16xf32>
    %9 = tpu.matmul %6, %7, %cst_7 {dimension_numbers = #tpu.dot_dimension_numbers<[1], [0], [0], [1], [0, 0, 1, 1], [], []>} : vector<4x32xf32>, vector<32x16xf32>, vector<4x16xf32> -> vector<4x16xf32>
    %cst_8 = arith.constant dense<0.000000e+00> : vector<4x32xf32>
    %10 = tpu.matmul %9, %8, %cst_8 {dimension_numbers = #tpu.dot_dimension_numbers<[1], [0], [0], [1], [0, 0, 1, 1], [], []>} : vector<4x16xf32>, vector<16x32xf32>, vector<4x32xf32> -> vector<4x32xf32>
    %cst_9 = arith.constant 0.000000e+00 : f32
    %11 = vector.broadcast %cst_9 : f32 to vector<4x32xf32>
    %12 = arith.maximumf %10, %11 : vector<4x32xf32>
    %13 = vector.extract_strided_slice %12 {offsets = [0, 0], sizes = [2, 32], strides = [1, 1]} : vector<4x32xf32> to vector<2x32xf32>
    %14 = vector.extract_strided_slice %12 {offsets = [2, 0], sizes = [2, 32], strides = [1, 1]} : vector<4x32xf32> to vector<2x32xf32>
    %15 = arith.addf %13, %14 : vector<2x32xf32>
    %cst_10 = arith.constant 0.000000e+00 : f32
    %16 = vector.broadcast %cst_10 : f32 to vector<2x32xf32>
    %17 = arith.subf %16, %15 : vector<2x32xf32>
    %18 = math.exp %17 : vector<2x32xf32>
    %cst_11 = arith.constant 1.000000e+00 : f32
    %19 = vector.broadcast %cst_11 : f32 to vector<2x32xf32>
    %20 = arith.addf %19, %18 : vector<2x32xf32>
    %cst_12 = arith.constant 1.000000e+00 : f32
    %21 = vector.broadcast %cst_12 : f32 to vector<2x32xf32>
    %22 = arith.divf %21, %20 : vector<2x32xf32>
    %c0_13 = arith.constant 0 : index
    %c0_14 = arith.constant 0 : index
    %23 = vector.load %arg4[%c0_13, %c0_14] : memref<32x512xf32, #tpu.memory_space<vmem>>, vector<32x512xf32>
    %cst_15 = arith.constant dense<0.000000e+00> : vector<2x512xf32>
    %24 = tpu.matmul %22, %23, %cst_15 {dimension_numbers = #tpu.dot_dimension_numbers<[1], [0], [0], [1], [0, 0, 1, 1], [], []>} : vector<2x32xf32>, vector<32x512xf32>, vector<2x512xf32> -> vector<2x512xf32>
    %25 = arith.mulf %0, %24 : vector<2x512xf32>
    %c0_16 = arith.constant 0 : index
    %c0_17 = arith.constant 0 : index
    %26 = vector.load %arg5[%c0_16, %c0_17] : memref<2x512xf32, #tpu.memory_space<vmem>>, vector<2x512xf32>
    tpu.vector_store %arg5[%c0_16, %c0_17], %25 {strides = array<i32>} : memref<2x512xf32, #tpu.memory_space<vmem>>, vector<2x512xf32>,
    return
  }
  func.func @transform_0(%arg0: i32) -> (i32, i32) {
    %c0_i32 = arith.constant 0 : i32
    %c0_i32_0 = arith.constant 0 : i32
    return %arg0, %c0_i32 : i32, i32
  }
  func.func @transform_1(%arg0: i32) -> (i32, i32) {
    %c0_i32 = arith.constant 0 : i32
    %c0_i32_0 = arith.constant 0 : i32
    %c0_i32_1 = arith.constant 0 : i32
    return %c0_i32, %c0_i32_0 : i32, i32
  }
  func.func @transform_2(%arg0: i32) -> (i32, i32) {
    %c0_i32 = arith.constant 0 : i32
    %c0_i32_0 = arith.constant 0 : i32
    %c0_i32_1 = arith.constant 0 : i32
    return %c0_i32, %c0_i32_0 : i32, i32
  }
  func.func @transform_3(%arg0: i32) -> (i32, i32) {
    %c0_i32 = arith.constant 0 : i32
    %c0_i32_0 = arith.constant 0 : i32
    %c0_i32_1 = arith.constant 0 : i32
    return %c0_i32, %c0_i32_0 : i32, i32
  }
  func.func @transform_4(%arg0: i32) -> (i32, i32) {
    %c0_i32 = arith.constant 0 : i32
    %c0_i32_0 = arith.constant 0 : i32
    return %arg0, %c0_i32 : i32, i32
  }
}

</mosaic_0001>

<bundles_post_ra>
// kernel: tpu_custom_call.1
= control target key start
LH: loop header
LB: loop body
LE: loop exit
PB: predicated region body
PF: predicated region fallthrough
CT: control target
= control target key end

     0   :  { %9 = vsyncpa [#allocation3], 0  ;;  %s1305_s0 = inlined_call_operand.vmem [shape: f32[2,512], index: 0, kind: input, shape index: {}]   ;;  %s1306_s1 = inlined_call_operand.vmem [shape: f32[32,16], index: 1, kind: input, shape index: {}]   ;;  %s1307_s2 = inlined_call_operand.vmem [shape: f32[16,32], index: 2, kind: input, shape index: {}]   ;;  %s1308_s3 = inlined_call_operand.hbm [shape: f32[32,512], index: 3, kind: input, shape index: {}]   ;;  %s1309_s4 = inlined_call_operand.hbm [shape: f32[2,512], index: 4, kind: output, shape index: {}]  }
   0x1   :  { %10 = vsyncpa [#allocation4], 0  ;;  %s1082_s15 = smov [#allocation2]   ;;  %s1034_s19 = scalar_lea.hbm %s1308_s3, 2048 }
   0x2   :  { %s22_s16 = sshll.u32 %s1082_s15, 4  ;;  %p1035_p0 = scmp.ne.s32.totalorder %s1308_s3, %s1034_s19  ;;  %s23_s16 = int_to_ptr.vmem [resolvable:$true] %s22_s16 }
   0x3   :  { %p1038_p1 = scmp.lt.u32.totalorder %s1034_s19, %s1308_s3 }
   0x5   :  { %p1040_p2 = pnand %p1038_p1, %p1035_p0 }
   0x7   :  { %1043 = shalt.err (!%p1040_p2)
}
   0x8   :  { %s1044_s24 = scalar_lea.vmem %s23_s16, 2048  ;;  %p1049_p4 = scmp.lt.s32.totalorder %s23_s16, %s23_s16 }
   0x9   :  { %p1045_p3 = scmp.ne.s32.totalorder %s23_s16, %s1044_s24  ;;  %p1050_p5 = scmp.lt.s32.totalorder %s1044_s24, %s1044_s24 }
   0xb   :  { %p1051_p6 = por %p1050_p5, %p1049_p4 }
   0xd   :  { %p1052_p7 = pnand %p1051_p6, %p1045_p3 }
   0xf   :  { %1055 = shalt.err (!%p1052_p7)
}
  0x10   :  { %s1083_s25 = smov 512   ;;  %s1084_s26 = smov 32  }
  0x11   :  { %28 = dma.hbm_to_vmem [thread:$0]  %s1308_s3, 2048, %s23_s16, [#allocation3], %s1083_s25, %s1083_s25, %s1084_s26  }
  0x12   :  { %1078 = dma.done.wait [#allocation3], 2048  }
  0x13   :  { %1079 = vsyncadd [#allocation3], 4294965248  ;;  %v1137_v0 = vld [vmem:[%s1305_s0] sm:$0xff]  ;;  %s1085_s5 = smov 112   ;;  %s1086_s6 = smov 80   ;;  %v107_v3 = vlaneseq  ;;  %vm423_vm0 = vcmask 130048  }
  0x14   :  { %36 = vrot.lane.b32.xlu0 %v1137_v0, %s1085_s5  ;;  %44 = vrot.lane.b32.xlu1 %v1137_v0, %s1086_s6  ;;  %s1087_s7 = smov 96   ;;  %s1088_s8 = smov 64   ;;  %v1091_v1 = vmov 1934713408   ;;  %v1092_v6 = vmov 1983009808  }
  0x15   :  { %s1089_s3 = smov 48   ;;  %s1090_s9 = smov 16   ;;  %v105_v2 = vunpack.c.l.s4 %v1091_v1  ;;  %v282_v7 = vunpack.c.l.s4 %v1092_v6  ;;  %v1151_v9 = vshrl.u32 %v107_v3, 7  ;;  %v34_v13 = vrot.slane %v1137_v0, 2 }
  0x16   :  { %v64_v17 = vrot.slane %v1137_v0, 4  ;;  %vm1094_vm1 = vmmov 0   ;;  %vm499_vm2 = vcmask 130112   ;;  %vm506_vm3 = vcmask 195712  }
  0x17   :  { %v106_v8 = vunpack.c.0.s8 %v105_v2  ;;  %v283_v15 = vunpack.c.0.s8 %v282_v7  ;;  %vm513_vm4 = vcmask 261312   ;;  %vm534_vm5 = vcmask 1041409  }
  0x18   :  { %40 = vrot.lane.b32.xlu0 %v1137_v0, %s1087_s7  ;;  %48 = vrot.lane.b32.xlu1 %v1137_v0, %s1088_s8  ;;  %vm583_vm6 = vcmask 1043459   ;;  %vm586_vm7 = vcmask 1041408   ;;  %vm594_vm8 = vcmask 261120  }
  0x19   :  { %v1166_v20 = vsub.s32 %v106_v8, %v1151_v9  ;;  %v1180_v34 = vsub.s32 %v283_v15, %v1151_v9 }
  0x1c   :  { %52 = vrot.lane.b32.xlu0 %v1137_v0, %s1089_s3  ;;  %56 = vrot.lane.b32.xlu1 %v1137_v0, %s1084_s26 }
  0x20   :  { %60 = vrot.lane.b32.xlu0 %v1137_v0, %s1090_s9 }
  0x86   :  { %v1146_v4 = vpop.permute.xlu0 %36  ;;  %v1148_v5 = vpop.permute.xlu1 %44 }
  0x87   :  { %v46_v10 = vrot.slane %v1148_v5, 2  ;;  %v38_v16 = vrot.slane %v1146_v4, 2  ;;  %v66_v18 = vrot.slane %v1146_v4, 4  ;;  %v103_v21 = vcombine.low %v1137_v0, %v1146_v4 }
  0x88   :  { %v70_v22 = vrot.slane %v1148_v5, 4  ;;  %v86_v44 = vrot.slane %v1148_v5, 6 }
  0x89   :  { %v139_v31 = vcombine.low %v34_v13, %v38_v16  ;;  %v175_v32 = vcombine.low %v64_v17, %v66_v18  ;;  %v110_v35 = vrot.slane %v103_v21, %v1166_v20 }
  0x8a   :  { %v1154_v11 = vpop.permute.xlu0 %40  ;;  %v1156_v12 = vpop.permute.xlu1 %48 }
  0x8b   :  { %v42_v14 = vrot.slane %v1154_v11, 2  ;;  %v112_v19 = vcombine.low %v1154_v11, %v1148_v5  ;;  %v68_v23 = vrot.slane %v1154_v11, 4  ;;  %v50_v25 = vrot.slane %v1156_v12, 2 }
  0x8c   :  { %v72_v26 = vrot.slane %v1156_v12, 4  ;;  %v146_v50 = vrot.slane %v139_v31, %v1166_v20  ;;  %v1191_v51 = vrot.slane %v175_v32, %v1166_v20  ;;  %v88_v15 = vrot.slane %v1156_v12, 6 }
  0x8d   :  { %v148_v24 = vcombine.low %v42_v14, %v46_v10  ;;  %v119_v33 = vrot.slane %v112_v19, %v1166_v20  ;;  %v184_v39 = vcombine.low %v68_v23, %v70_v22  ;;  %v84_v14 = vrot.slane %v1154_v11, 6 }
  0x8e   :  { %v1174_v27 = vpop.permute.xlu0 %52  ;;  %v57_v28 = vpop.permute.xlu1 %56  ;;  %v80_v23 = vrot.slane %v1137_v0, 6 }
  0x8f   :  { %v54_v29 = vrot.slane %v1174_v27, 2  ;;  %v74_v30 = vrot.slane %v1174_v27, 4  ;;  %v121_v36 = vcombine.low %v1156_v12, %v1174_v27  ;;  %v58_v37 = vrot.slane %v57_v28, 2 }
  0x90   :  { %v76_v38 = vrot.slane %v57_v28, 4  ;;  %v1186_v43 = vrot.slane %v148_v24, %v1166_v20  ;;  %v952_v48 = vcombine.high %v110_v35, %v119_v33  ;;  %v279_v49 = vcombine.low %v110_v35, %v119_v33 }
  0x91   :  { %v157_v40 = vcombine.low %v50_v25, %v54_v29  ;;  %v193_v41 = vcombine.low %v72_v26, %v74_v30  ;;  %v128_v52 = vrot.slane %v121_v36, %v1166_v20  ;;  %v191_v58 = vrot.slane %v184_v39, %v1166_v20 }
  0x92   :  { %v61_v42 = vpop.permute.xlu0 %60  ;;  %v954_v57 = vcombine.high %v146_v50, %v1186_v43  ;;  %v92_v1 = vrot.slane %v57_v28, 6  ;;  %v355_v5 = vrot.slane %v952_v48, %v1180_v34  ;;  %v287_v6 = vrot.slane %v279_v49, %v1180_v34 }
  0x93   :  { %v62_v45 = vrot.slane %v61_v42, 2  ;;  %v78_v46 = vrot.slane %v61_v42, 4  ;;  %v130_v47 = vcombine.low %v57_v28, %v61_v42  ;;  %v164_v56 = vrot.slane %v157_v40, %v1166_v20 }
  0x94   :  { %v200_v59 = vrot.slane %v193_v41, %v1166_v20  ;;  %v94_v2 = vrot.slane %v61_v42, 6  ;;  %v90_v16 = vrot.slane %v1174_v27, 6  ;;  %v372_v17 = vrot.slane %v954_v57, %v1180_v34 }
  0x95   :  { %v137_v53 = vrot.slane %v130_v47, %v1166_v20  ;;  %v166_v54 = vcombine.low %v58_v37, %v62_v45  ;;  %v202_v55 = vcombine.low %v76_v38, %v78_v46  ;;  %v956_v22 = vcombine.high %v1191_v51, %v191_v58 }
  0x96   :  { %v82_v24 = vrot.slane %v1146_v4, 6  ;;  %v238_v25 = vcombine.low %v92_v1, %v94_v2  ;;  %v229_v29 = vcombine.low %v88_v15, %v90_v16  ;;  %v220_v30 = vcombine.low %v84_v14, %v86_v44  ;;  %v590_v16 = vld [vmem:[%s1306_s1 + $0x10] sm:$0xff] }
  0x97   :  { %v953_v60 = vcombine.high %v128_v52, %v137_v53  ;;  %v280_v61 = vcombine.low %v128_v52, %v137_v53  ;;  %v173_v62 = vrot.slane %v166_v54, %v1166_v20  ;;  %v209_v63 = vrot.slane %v202_v55, %v1166_v20 }
  0x98   :  { %v389_v31 = vrot.slane %v956_v22, %v1180_v34  ;;  %v296_v32 = vcombine.low %v146_v50, %v1186_v43  ;;  %v211_v33 = vcombine.low %v80_v23, %v82_v24  ;;  %v245_v4 = vrot.slane %v238_v25, %v1166_v20  ;;  %v593_v22 = vld [vmem:[%s1307_s2 + $0x8] sm:$0xff] }
  0x99   :  { %v362_v7 = vrot.slane %v953_v60, %v1180_v34  ;;  %v294_v8 = vrot.slane %v280_v61, %v1180_v34  ;;  %v955_v10 = vcombine.high %v164_v56, %v173_v62  ;;  %v957_v13 = vcombine.high %v200_v59, %v209_v63 }
  0x9a   :  { %v297_v26 = vcombine.low %v164_v56, %v173_v62  ;;  %v314_v35 = vcombine.low %v200_v59, %v209_v63  ;;  %v313_v40 = vcombine.low %v1191_v51, %v191_v58  ;;  %v236_v41 = vrot.slane %v229_v29, %v1166_v20 }
  0x9b   :  { %v363_v18 = vcombine.low %v355_v5, %v362_v7  ;;  %v295_v19 = vcombine.low %v287_v6, %v294_v8  ;;  %v379_v21 = vrot.slane %v955_v10, %v1180_v34  ;;  %v396_v27 = vrot.slane %v957_v13, %v1180_v34  ;;  %v588_v10 = vld [vmem:[%s1306_s1] sm:$0xff]  ;;  %v589_v13 = vld [vmem:[%s1306_s1 + $0x8] sm:$0xff] }
  0x9c   :  { %v311_v39 = vrot.slane %v297_v26, %v1180_v34  ;;  %v304_v42 = vrot.slane %v296_v32, %v1180_v34  ;;  %v227_v43 = vrot.slane %v220_v30, %v1166_v20  ;;  %v328_v44 = vrot.slane %v314_v35, %v1180_v34 }
  0x9d   :  { %v460_v11 = vsel %vm423_vm0, %v363_v18, 0.0  ;;  %v448_v12 = vsel %vm423_vm0, %v295_v19, 0.0  ;;  %v380_v28 = vcombine.low %v372_v17, %v379_v21  ;;  %v424_v36 = vsel %vm423_vm0, %v295_v19, -inf  ;;  %v591_v17 = vld [vmem:[%s1306_s1 + $0x18] sm:$0xff]  ;;  %v592_v21 = vld [vmem:[%s1307_s2] sm:$0xff]  ;;  %s1096_s1 = smov [#allocation5]  }
  0x9e   :  { %461 = vadd.xlane.f32.xlu0 %v460_v11  ;;  %449 = vadd.xlane.f32.xlu1 %v448_v12  ;;  %v397_v38 = vcombine.low %v389_v31, %v396_v27  ;;  %v218_v45 = vrot.slane %v211_v33, %v1166_v20  ;;  %v331_v46 = vcombine.low %v236_v41, %v245_v4  ;;  %v436_v47 = vsel %vm423_vm0, %v363_v18, -inf  ;;  %s943_s2 = sshll.u32 %s1096_s1, 4  ;;  %s944_s2 = int_to_ptr.vmem [resolvable:$true] %s943_s2 }
  0x9f   :  { %v463_v37 = vsel %vm423_vm0, %v380_v28, 0.0  ;;  %v312_v49 = vcombine.low %v304_v42, %v311_v39  ;;  %v959_v50 = vcombine.high %v236_v41, %v245_v4  ;;  %v321_v51 = vrot.slane %v313_v40, %v1180_v34  ;;  %s1056_s21 = scalar_lea.vmem %s944_s2, 128  ;;  %p1061_p9 = scmp.lt.s32.totalorder %s944_s2, %s944_s2 }
  0xa0   :  { %v466_v48 = vsel %vm423_vm0, %v397_v38, 0.0  ;;  %v330_v52 = vcombine.low %v218_v45, %v227_v43  ;;  %v958_v53 = vcombine.high %v218_v45, %v227_v43  ;;  %v345_v20 = vrot.slane %v331_v46, %v1180_v34  ;;  %p1057_p8 = scmp.ne.s32.totalorder %s944_s2, %s1056_s21  ;;  %p1062_p10 = scmp.lt.s32.totalorder %s1056_s21, %s1056_s21 }
  0xa1   :  { %v329_v54 = vcombine.low %v321_v51, %v328_v44  ;;  %v451_v55 = vsel %vm423_vm0, %v312_v49, 0.0  ;;  %v427_v56 = vsel %vm423_vm0, %v312_v49, -inf  ;;  %v413_v57 = vrot.slane %v959_v50, %v1180_v34 }
  0xa2   :  { %425 = vmax.xlane.f32.xlu0 %v424_v36  ;;  %464 = vadd.xlane.f32.xlu1 %v463_v37  ;;  %v338_v58 = vrot.slane %v330_v52, %v1180_v34  ;;  %v406_v59 = vrot.slane %v958_v53, %v1180_v34  ;;  %v439_v61 = vsel %vm423_vm0, %v380_v28, -inf  ;;  %v442_v6 = vsel %vm423_vm0, %v397_v38, -inf  ;;  %p1063_p11 = por %p1062_p10, %p1061_p9 }
  0xa3   :  { %v454_v60 = vsel %vm423_vm0, %v329_v54, 0.0  ;;  %v430_v5 = vsel %vm423_vm0, %v329_v54, -inf  ;;  %v1093_v14 = vmov 0.0|0.0   ;;  %v991_v15 = vpack.c.bf16 %v589_v13, %v588_v10 }
  0xa4   :  { %v346_v62 = vcombine.low %v338_v58, %v345_v20  ;;  %v414_v63 = vcombine.low %v406_v59, %v413_v57  ;;  %990 = vmatprep.subr.bf16.mxu0 %v1093_v14  ;;  %996 = vmatprep.subr.bf16.mxu1 %v1093_v14  ;;  %v994_v18 = vpack.c.bf16 %v591_v17, %v590_v16  ;;  %v1095_v19 = vmov 0.0   ;;  %p1064_p12 = pnand %p1063_p11, %p1057_p8 }
  0xa5   :  { %992 = vmatpush3.bf16.msra.mxu0 %v991_v15  ;;  %980 = vmatprep.mubr.msk.f32.mxu0 %vm1094_vm1, %v1095_v19  ;;  %v997_v23 = vpack.c.bf16 %v593_v22, %v592_v21  ;;  %v489_v30 = vand.u32 127, %v107_v3 }
  0xa6   :  { %437 = vmax.xlane.f32.xlu0 %v436_v47  ;;  %467 = vadd.xlane.f32.xlu1 %v466_v48  ;;  %v457_v1 = vsel %vm423_vm0, %v346_v62, 0.0  ;;  %v469_v2 = vsel %vm423_vm0, %v414_v63, 0.0  ;;  %v433_v7 = vsel %vm423_vm0, %v346_v62, -inf  ;;  %v445_v8 = vsel %vm423_vm0, %v414_v63, -inf }
  0xa7   :  { %993 = vmatprep.subr.bf16.mxu0 %v1093_v14  ;;  %987 = vmatprep.mubr.msk.f32.mxu1 %vm1094_vm1, %v1095_v19  ;;  %v494_v31 = vadd.s32 4294967288, %v489_v30  ;;  %v501_v32 = vadd.s32 4294967280, %v489_v30  ;;  %v508_v4 = vadd.s32 4294967272, %v489_v30  ;;  %v492_v36 = vsub.s32 %v489_v30, %v1151_v9  ;;  %v759_v30 = vld [vmem:[#allocation2 + $0x38] sm:$0xff] }
  0xa8   :  { %998 = vmatpush3.bf16.msra.mxu1 %v997_v23 }
  0xa9   :  { %995 = vmatpush3.bf16.msra.mxu0 %v994_v18  ;;  %v497_v37 = vsub.s32 %v494_v31, %v1151_v9  ;;  %v504_v40 = vsub.s32 %v501_v32, %v1151_v9  ;;  %v511_v43 = vsub.s32 %v508_v4, %v1151_v9  ;;  %v752_v31 = vld [vmem:[#allocation2] sm:$0xff]  ;;  %v754_v4 = vld [vmem:[#allocation2 + $0x10] sm:$0xff] }
  0xaa   :  { %452 = vadd.xlane.f32.xlu0 %v451_v55  ;;  %428 = vmax.xlane.f32.xlu1 %v427_v56  ;;  %v756_v32 = vld [vmem:[#allocation2 + $0x20] sm:$0xff] }
  0xae   :  { %455 = vadd.xlane.f32.xlu0 %v454_v60  ;;  %440 = vmax.xlane.f32.xlu1 %v439_v61 }
  0xb2   :  { %458 = vadd.xlane.f32.xlu0 %v457_v1  ;;  %470 = vadd.xlane.f32.xlu1 %v469_v2 }
  0xb6   :  { %431 = vmax.xlane.f32.xlu0 %v430_v5  ;;  %443 = vmax.xlane.f32.xlu1 %v442_v6 }
  0xba   :  { %434 = vmax.xlane.f32.xlu0 %v433_v7  ;;  %446 = vmax.xlane.f32.xlu1 %v445_v8 }
 0x12b   :  { %v462_v24 = vpop.xlane.xlu0 %461  ;;  %v450_v25 = vpop.xlane.xlu1 %449 }
 0x12c   :  { %v476_v3 = vmul.f32 0.0625, %v462_v24  ;;  %v472_v46 = vmul.f32 0.0625, %v450_v25 }
 0x12e   :  { %v567_v20 = vrot.slane %v476_v3, %v492_v36  ;;  %v548_v57 = vrot.slane %v472_v46, %v492_v36  ;;  %v766_v46 = vld [vmem:[#allocation2 + $0x70] sm:$0xff] }
 0x12f   :  { %v426_v26 = vpop.xlane.xlu0 %425  ;;  %v465_v11 = vpop.xlane.xlu1 %464 }
 0x130   :  { %v477_v38 = vmul.f32 0.0625, %v465_v11  ;;  %v493_v59 = vrot.slane %v426_v26, %v492_v36 }
 0x132   :  { %v571_v49 = vrot.slane %v477_v38, %v497_v37 }
 0x133   :  { %v438_v12 = vpop.xlane.xlu0 %437  ;;  %v468_v28 = vpop.xlane.xlu1 %467 }
 0x134   :  { %v478_v41 = vmul.f32 0.0625, %v468_v28  ;;  %v518_v60 = vrot.slane %v438_v12, %v492_v36  ;;  %v572_v63 = vsel %vm499_vm2, %v571_v49, %v567_v20  ;;  %v753_v12 = vld [vmem:[#allocation2 + $0x8] sm:$0xff]  ;;  %v758_v36 = vld [vmem:[#allocation2 + $0x30] sm:$0xff] }
 0x135   :  { %v757_v28 = vld [vmem:[#allocation2 + $0x28] sm:$0xff]  ;;  %v1009_v38 = vpack.c.bf16 %v758_v36, %v754_v4 }
 0x136   :  { %v576_v51 = vrot.slane %v478_v41, %v504_v40  ;;  %v767_v41 = vld [vmem:[#allocation2 + $0x78] sm:$0xff] }
 0x137   :  { %v453_v27 = vpop.xlane.xlu0 %452  ;;  %v429_v29 = vpop.xlane.xlu1 %428 }
 0x138   :  { %v473_v39 = vmul.f32 0.0625, %v453_v27  ;;  %v498_v52 = vrot.slane %v429_v29, %v497_v37  ;;  %v577_v2 = vsel %vm506_vm3, %v576_v51, %v572_v63  ;;  %v755_v27 = vld [vmem:[#allocation2 + $0x18] sm:$0xff]  ;;  %v999_v29 = vpack.c.bf16 %v757_v28, %v753_v12 }
 0x13a   :  { %v552_v50 = vrot.slane %v473_v39, %v497_v37  ;;  %v500_v5 = vsel %vm499_vm2, %v498_v52, %v493_v59  ;;  %1000 = vmatprep.subr.bf16.mxu1 %v999_v29  ;;  %v765_v39 = vld [vmem:[#allocation2 + $0x68] sm:$0xff] }
 0x13b   :  { %v456_v33 = vpop.xlane.xlu0 %455  ;;  %v441_v35 = vpop.xlane.xlu1 %440 }
 0x13c   :  { %v474_v42 = vmul.f32 0.0625, %v456_v33  ;;  %v522_v54 = vrot.slane %v441_v35, %v497_v37  ;;  %v553_v1 = vsel %vm499_vm2, %v552_v50, %v548_v57  ;;  %v1007_v33 = vpack.c.bf16 %v759_v30, %v755_v27  ;;  %v761_v37 = vld [vmem:[#allocation2 + $0x48] sm:$0xff] }
 0x13d   :  { %v1001_v35 = vpack.c.bf16 %v756_v32, %v752_v31 }
 0x13e   :  { %v557_v53 = vrot.slane %v474_v42, %v504_v40  ;;  %v523_v7 = vsel %vm499_vm2, %v522_v54, %v518_v60  ;;  %1008 = vmatprep.subr.bf16.mxu0 %v1007_v33 }
 0x13f   :  { %v459_v44 = vpop.xlane.xlu0 %458  ;;  %v471_v45 = vpop.xlane.xlu1 %470 }
 0x140   :  { %v475_v47 = vmul.f32 0.0625, %v459_v44  ;;  %v479_v48 = vmul.f32 0.0625, %v471_v45  ;;  %v558_v6 = vsel %vm506_vm3, %v557_v53, %v553_v1  ;;  %v764_v44 = vld [vmem:[#allocation2 + $0x60] sm:$0xff]  ;;  %v762_v45 = vld [vmem:[#allocation2 + $0x50] sm:$0xff] }
 0x142   :  { %v562_v9 = vrot.slane %v475_v47, %v511_v43  ;;  %v581_v58 = vrot.slane %v479_v48, %v511_v43  ;;  %v1013_v47 = vpack.c.bf16 %v766_v46, %v762_v45 }
 0x143   :  { %v432_v55 = vpop.xlane.xlu0 %431  ;;  %v444_v56 = vpop.xlane.xlu1 %443 }
 0x144   :  { %v505_v61 = vrot.slane %v432_v55, %v504_v40  ;;  %v527_v62 = vrot.slane %v444_v56, %v504_v40  ;;  %v563_v13 = vsel %vm513_vm4, %v562_v9, %v558_v6  ;;  %v582_v14 = vsel %vm513_vm4, %v581_v58, %v577_v2  ;;  %v763_v40 = vld [vmem:[#allocation2 + $0x58] sm:$0xff] }
 0x145   :  { %v584_v24 = vsel %vm583_vm6, %v582_v14, %v563_v13  ;;  %v1011_v42 = vpack.c.bf16 %v767_v41, %v763_v40 }
 0x146   :  { %v507_v17 = vsel %vm506_vm3, %v505_v61, %v500_v5  ;;  %v528_v18 = vsel %vm506_vm3, %v527_v62, %v523_v7 }
 0x147   :  { %v435_v8 = vpop.xlane.xlu0 %434  ;;  %v447_v10 = vpop.xlane.xlu1 %446 }
 0x148   :  { %v512_v15 = vrot.slane %v435_v8, %v511_v43  ;;  %v532_v16 = vrot.slane %v447_v10, %v511_v43  ;;  %v760_v43 = vld [vmem:[#allocation2 + $0x40] sm:$0xff] }
 0x149   :  { %v1005_v3 = vpack.c.bf16 %v764_v44, %v760_v43 }
 0x14a   :  { %v514_v21 = vsel %vm513_vm4, %v512_v15, %v507_v17  ;;  %v533_v22 = vsel %vm513_vm4, %v532_v16, %v528_v18 }
 0x14b   :  { %v535_v23 = vsel %vm534_vm5, %v533_v22, %v514_v21 }
 0x14c   :  { %v587_v25 = vsel %vm586_vm7, %v535_v23, %v584_v24 }
 0x14d   :  { %981 = vmatmul.mubr.msk.f32.vlgmr.msra.gmra.mrb[0].mxu0 %vm594_vm8, %v587_v25 }
 0x14e   :  { %906 = vmatprep.mubr.f32.mxu0 %v1095_v19  ;;  %1010 = vmatpush1.bf16.msra.mxu0 %v1009_v38 }
 0x14f   :  { %1012 = vmatprep.subr.bf16.mxu0 %v1011_v42 }
 0x152   :  { %1014 = vmatpush1.bf16.msra.mxu0 %v1013_v47 }
 0x220   :  { %v664_v26 = vpop.f32.mrb[0].mxu0 }
 0x221   :  { %v982_v11 = vpop.f32.mrb[1].mxu0  ;;  %988 = vmatmul.mubr.msk.f32.vlgmr.msra.gmra.mrb[0].mxu1 %vm423_vm0, %v664_v26 }
 0x222   :  { %835 = vmatprep.mubr.f32.mxu1 %v1095_v19  ;;  %1002 = vmatpush1.bf16.msra.mxu1 %v1001_v35  ;;  %v1003_v19 = vpack.c.bf16 %v765_v39, %v761_v37 }
 0x224   :  { %1004 = vmatprep.subr.bf16.mxu1 %v1003_v19 }
 0x226   :  { %1006 = vmatpush1.bf16.msra.mxu1 %v1005_v3 }
 0x2f4   :  { %v737_v48 = vpop.f32.mrb[0].mxu1 }
 0x2f5   :  { %v741_v49 = vmax.f32 %v737_v48, 0.0  ;;  %v989_v50 = vpop.f32.mrb[1].mxu1 }
 0x2f7   :  { %v743_v51 = vrot.slane %v741_v49, 2 }
 0x2f9   :  { %v745_v52 = vadd.f32 %v743_v51, %v741_v49 }
 0x2fb   :  { %v746_v53 = vsub.f32 0.0, %v745_v52 }
 0x2fd   :  { %v747_v54 = vmul.f32 1.442695, %v746_v53 }
 0x2ff   :  { %1030 = vpow2.f32 %v747_v54 }
 0x309   :  { %v1031_v55 = vpop.eup %1030 }
 0x30a   :  { %v749_v56 = vadd.f32 1.0, %v1031_v55 }
 0x30c   :  { %1032 = vrcp.f32 %v749_v56 }
 0x316   :  { %v1033_v20 = vpop.eup %1032 }
 0x317   :  { %962 = vmatmul.mubr.msk.f32.vlgmr.msra.gmra.mrb[2].mxu1 %vm594_vm8, %v1033_v20  ;;  %963 = vmatmul.mubr.msk.f32.vlgmr.msra.gmra.mrb[2].mxu0 %vm594_vm8, %v1033_v20 }
 0x3ea   :  { %v837_v57 = vpop.f32.mrb[2].mxu1  ;;  %v908_v9 = vpop.f32.mrb[2].mxu0 }
 0x3eb   :  { %v839_v58 = vpop.f32.mrb[3].mxu1  ;;  %v910_v59 = vpop.f32.mrb[3].mxu0 }
 0x3ec   :  { %v917_v60 = vcombine.low %v837_v57, %v839_v58  ;;  %v918_v61 = vcombine.low %v908_v9, %v910_v59 }
 0x3ee   :  { %v925_v62 = vrot.slane %v917_v60, %v1180_v34  ;;  %v932_v63 = vrot.slane %v918_v61, %v1180_v34 }
 0x3f0   :  { %v933_v1 = vcombine.low %v925_v62, %v932_v63 }
 0x3f2   :  { %v935_v2 = vmul.f32 %v933_v1, %v1137_v0 }
 0x3f4   :  { %936 = vst [vmem:[#allocation5] sm:$0xff] %v935_v2 }
 0x3f5   :  { %1067 = shalt.err (!%p1064_p12)
}
 0x3f6   :  { %s1068_s24 = scalar_lea.hbm %s1309_s4, 128 }
 0x3f7   :  { %p1069_p13 = scmp.ne.s32.totalorder %s1309_s4, %s1068_s24  ;;  %p1072_p0 = scmp.lt.u32.totalorder %s1068_s24, %s1309_s4 }
 0x3f9   :  { %p1074_p1 = pnand %p1072_p0, %p1069_p13 }
 0x3fb   :  { %1077 = shalt.err (!%p1074_p1)
}
 0x3fc   :  { %946 = dma.vmem_to_hbm [thread:$0]  %s944_s2, 128, %s1309_s4, [#allocation4]  }
 0x3fd   :  { %1080 = dma.done.wait [#allocation4], 128  }
 0x3fe   :  { %1081 = vsyncadd [#allocation4], 4294967168 }
 0x3ff   :  { %950 = vsyncpa [#allocation3], 1 }
 0x400   :  { %951 = vsyncpa [#allocation4], 1 }

</bundles_post_ra>
